<compile_context>
chip_gen: v7x
topology: tpu7x:2x2x1
jax: 0.10.0
libtpu: 0.0.40
codegen_flags: <defaults>
</compile_context>

<pallas_src>
import functools

import jax
import jax.numpy as jnp
from jax.experimental import pallas as pl
from jax.experimental.pallas import tpu as pltpu

LANE = 128     # TPU lane width (last-dim tile)
SUBLANE = 8    # TPU sublane width (second-last-dim tile)


def generator_kernel(x_ref, w1_ref, b1_ref, w2_ref, b2_ref, w3_ref, b3_ref,
                     o_ref, *, bf16_tanh):
    # fc1 + ReLU  (bf16 MXU matmul, f32 accumulate, f32 elementwise)
    h = jnp.dot(x_ref[...], w1_ref[...], preferred_element_type=jnp.float32)
    h = jnp.maximum(h + b1_ref[...], 0.0)
    # fc2 + ReLU
    h = jnp.dot(h.astype(jnp.bfloat16), w2_ref[...],
                preferred_element_type=jnp.float32)
    h = jnp.maximum(h + b2_ref[...], 0.0)
    # fc3 + Tanh  (output is lane-dense: padded to a multiple of 128)
    h = jnp.dot(h.astype(jnp.bfloat16), w3_ref[...],
                preferred_element_type=jnp.float32)
    h = h + b3_ref[...]
    if bf16_tanh:
        # v6e/v7x: bf16 tanh halves the EUP work and removes the post-tanh cast.
        o_ref[...] = jnp.tanh(h.astype(jnp.bfloat16)).astype(o_ref.dtype)
    else:
        # v5e/older: no bf16 EUP — keep the transcendental in f32.
        o_ref[...] = jnp.tanh(h).astype(o_ref.dtype)


def _tpu_kind():
    try:
        return jax.devices()[0].device_kind.lower()
    except Exception:
        return ""


def _choose_blocking(batch, n_cores, max_block=512):
    """Pad batch only to a sublane multiple and split it into
    max(n_cores, cdiv(rows, max_block)) equal, 8-row-aligned tiles."""
    padded = SUBLANE * pl.cdiv(batch, SUBLANE)
    n_tiles = max(n_cores, pl.cdiv(padded, max_block))
    block_b = SUBLANE * pl.cdiv(padded, n_tiles * SUBLANE)
    padded = block_b * n_tiles
    return padded, block_b, n_tiles


def generator_forward(x, params, image_size, *, max_block=512, unpad=True):
    """x: (B, latent) f32.  params: bf16 weights (in,out) + f32 biases (1,out);
    the last layer is already zero-padded to a multiple of 128 output columns.
    Returns bf16 activations; pass unpad=False to keep the padded slab and
    avoid the wrapper-side slice copy."""
    w1, b1, w2, b2, w3, b3 = params
    B, latent = x.shape
    hidden = w1.shape[1]
    img_pad = w3.shape[1]

    kind = _tpu_kind()
    n_cores = 2 if ("v7" in kind or "7x" in kind) else 1       # v7x: 2 TCs/chip
    bf16_tanh = ("v6" in kind) or ("v7" in kind) or ("7x" in kind)

    padded_b, block_b, n_tiles = _choose_blocking(B, n_cores, max_block)

    xb = x.astype(jnp.bfloat16)
    if padded_b != B:
        xb = jnp.pad(xb, ((0, padded_b - B), (0, 0)))

    const = lambda i: (0, 0)  # weights/biases: one block, resident in VMEM

    cost = pl.CostEstimate(
        flops=2 * padded_b * (latent * hidden + hidden * hidden + hidden * img_pad),
        transcendentals=padded_b * img_pad,                 # tanh
        bytes_accessed=(
            xb.size * 2                                     # bf16 activations in
            + (w1.size + w2.size + w3.size) * 2             # bf16 weights
            + (b1.size + b2.size + b3.size) * 4             # f32 biases
            + padded_b * img_pad * 2                        # bf16 output
        ),
    )

    out = pl.pallas_call(
        functools.partial(generator_kernel, bf16_tanh=bf16_tanh),
        out_shape=jax.ShapeDtypeStruct((padded_b, img_pad), jnp.bfloat16),
        grid=(n_tiles,),
        in_specs=[
            pl.BlockSpec((block_b, latent), lambda i: (i, 0)),  # x: tiled by batch
            pl.BlockSpec((latent, hidden), const),              # w1 (resident)
            pl.BlockSpec((1, hidden), const),                   # b1
            pl.BlockSpec((hidden, hidden), const),              # w2
            pl.BlockSpec((1, hidden), const),                   # b2
            pl.BlockSpec((hidden, img_pad), const),             # w3 (lane-padded)
            pl.BlockSpec((1, img_pad), const),                  # b3
        ],
        out_specs=pl.BlockSpec((block_b, img_pad), lambda i: (i, 0)),
        compiler_params=pltpu.CompilerParams(
            dimension_semantics=("parallel",),   # megacore split on v7x
        ),
        cost_estimate=cost,
    )(xb, w1, b1, w2, b2, w3, b3)

    if unpad and (padded_b != B or img_pad != image_size):
        # Note: this slice is an extra HBM round-trip; perf-sensitive callers
        # should pass unpad=False and consume the padded slab directly.
        out = out[:B, :image_size]
    return out


def init_linear(key, fan_in, fan_out):
    """Deterministic init mimicking torch.nn.Linear (uniform +/- 1/sqrt(fan_in)).
    Weight is (fan_in, fan_out) (transposed vs. PyTorch) so the kernel does x @ W."""
    kw, kb = jax.random.split(key)
    bound = 1.0 / jnp.sqrt(jnp.float32(fan_in))
    w = jax.random.uniform(kw, (fan_in, fan_out), jnp.float32, -bound, bound)
    b = jax.random.uniform(kb, (1, fan_out), jnp.float32, -bound, bound)
    return w, b


def prepare_params(w1, b1, w2, b2, w3, b3):
    """Cast weights to bf16 (MXU operands) and zero-pad the last layer to a
    lane-dense multiple-of-128 output width. Biases stay f32 (elementwise path)."""
    image_size = w3.shape[1]
    img_pad = LANE * pl.cdiv(image_size, LANE)
    pad = img_pad - image_size
    w3p = jnp.pad(w3, ((0, 0), (0, pad)))
    b3p = jnp.pad(b3, ((0, 0), (0, pad)))
    return (
        w1.astype(jnp.bfloat16), b1,
        w2.astype(jnp.bfloat16), b2,
        w3p.astype(jnp.bfloat16), b3p,
    )


def reference_bf16(x, params_f32):
    """Pure-JAX reference with the same bf16-operand / f32-accumulate precision."""
    w1, b1, w2, b2, w3, b3 = params_f32
    f32 = lambda a: a.astype(jnp.bfloat16).astype(jnp.float32)
    h = jnp.maximum(f32(x) @ f32(w1) + b1, 0.0)
    h = jnp.maximum(f32(h) @ f32(w2) + b2, 0.0)
    return jnp.tanh(f32(h) @ f32(w3) + b3)


if __name__ == "__main__":
    latent_size, hidden_size, image_size = 16, 32, 64
    batch = 300  # not a multiple of 8: exercises the (minimal) tail padding

    key = jax.random.PRNGKey(0)
    k_x, k1, k2, k3 = jax.random.split(key, 4)

    x = jax.random.normal(k_x, (batch, latent_size), jnp.float32)
    w1, b1 = init_linear(k1, latent_size, hidden_size)
    w2, b2 = init_linear(k2, hidden_size, hidden_size)
    w3, b3 = init_linear(k3, hidden_size, image_size)

    params = prepare_params(w1, b1, w2, b2, w3, b3)

    out = generator_forward(x, params, image_size)
    jax.block_until_ready(out)

    ref = reference_bf16(x, (w1, b1, w2, b2, w3, b3))
    assert out.shape == (batch, image_size)
    err = float(jnp.max(jnp.abs(out.astype(jnp.float32) - ref)))
    # bf16 output (and bf16 tanh on v6e/v7x) => ~1e-2 tolerance vs f32 reference.
    assert jnp.allclose(out.astype(jnp.float32), ref, atol=2e-2, rtol=2e-2), err

    print("KERNEL_OK")
</pallas_src>

<mosaic_0001>
module attributes {stable_mosaic.version = 11 : i64} {
  func.func @generator_kernel(%arg0: i32, %arg1: memref<304x16xbf16, #tpu.memory_space<vmem>>, %arg2: memref<16x32xbf16, #tpu.memory_space<vmem>>, %arg3: memref<1x32xf32, #tpu.memory_space<vmem>>, %arg4: memref<32x32xbf16, #tpu.memory_space<vmem>>, %arg5: memref<1x32xf32, #tpu.memory_space<vmem>>, %arg6: memref<32x128xbf16, #tpu.memory_space<vmem>>, %arg7: memref<1x128xf32, #tpu.memory_space<vmem>>, %arg8: memref<304x128xbf16, #tpu.memory_space<vmem>>) attributes {dimension_semantics = [#tpu.dimension_semantics<parallel>], iteration_bounds = array<i64: 1>, scalar_prefetch = 0 : i64, scratch_operands = 0 : i64, tpu.core_type = #tpu.core_type<tc>, window_params = [{transform_indices = @transform_0, window_bounds = array<i64: 304, 16>}, {pipeline_mode = #tpu.pipeline_mode<synchronous>, transform_indices = @transform_1, window_bounds = array<i64: 16, 32>}, {pipeline_mode = #tpu.pipeline_mode<synchronous>, transform_indices = @transform_2, window_bounds = array<i64: 1, 32>}, {pipeline_mode = #tpu.pipeline_mode<synchronous>, transform_indices = @transform_3, window_bounds = array<i64: 32, 32>}, {pipeline_mode = #tpu.pipeline_mode<synchronous>, transform_indices = @transform_4, window_bounds = array<i64: 1, 32>}, {pipeline_mode = #tpu.pipeline_mode<synchronous>, transform_indices = @transform_5, window_bounds = array<i64: 32, 128>}, {pipeline_mode = #tpu.pipeline_mode<synchronous>, transform_indices = @transform_6, window_bounds = array<i64: 1, 128>}, {transform_indices = @transform_7, window_bounds = array<i64: 304, 128>}]} {
    %c0 = arith.constant 0 : index
    %c0_0 = arith.constant 0 : index
    %0 = vector.load %arg1[%c0, %c0_0] : memref<304x16xbf16, #tpu.memory_space<vmem>>, vector<304x16xbf16>
    %c0_1 = arith.constant 0 : index
    %c0_2 = arith.constant 0 : index
    %1 = vector.load %arg2[%c0_1, %c0_2] : memref<16x32xbf16, #tpu.memory_space<vmem>>, vector<16x32xbf16>
    %cst = arith.constant dense<0.000000e+00> : vector<304x32xf32>
    %2 = tpu.matmul %0, %1, %cst {dimension_numbers = #tpu.dot_dimension_numbers<[1], [0], [0], [1], [0, 0, 1, 1], [], []>} : vector<304x16xbf16>, vector<16x32xbf16>, vector<304x32xf32> -> vector<304x32xf32>
    %c0_3 = arith.constant 0 : index
    %c0_4 = arith.constant 0 : index
    %3 = vector.load %arg3[%c0_3, %c0_4] : memref<1x32xf32, #tpu.memory_space<vmem>>, vector<1x32xf32>
    %4 = vector.broadcast %3 : vector<1x32xf32> to vector<304x32xf32>
    %5 = arith.addf %2, %4 : vector<304x32xf32>
    %cst_5 = arith.constant 0.000000e+00 : f32
    %6 = vector.broadcast %cst_5 : f32 to vector<304x32xf32>
    %7 = arith.maximumf %5, %6 : vector<304x32xf32>
    %8 = arith.truncf %7 : vector<304x32xf32> to vector<304x32xbf16>
    %c0_6 = arith.constant 0 : index
    %c0_7 = arith.constant 0 : index
    %9 = vector.load %arg4[%c0_6, %c0_7] : memref<32x32xbf16, #tpu.memory_space<vmem>>, vector<32x32xbf16>
    %cst_8 = arith.constant dense<0.000000e+00> : vector<304x32xf32>
    %10 = tpu.matmul %8, %9, %cst_8 {dimension_numbers = #tpu.dot_dimension_numbers<[1], [0], [0], [1], [0, 0, 1, 1], [], []>} : vector<304x32xbf16>, vector<32x32xbf16>, vector<304x32xf32> -> vector<304x32xf32>
    %c0_9 = arith.constant 0 : index
    %c0_10 = arith.constant 0 : index
    %11 = vector.load %arg5[%c0_9, %c0_10] : memref<1x32xf32, #tpu.memory_space<vmem>>, vector<1x32xf32>
    %12 = vector.broadcast %11 : vector<1x32xf32> to vector<304x32xf32>
    %13 = arith.addf %10, %12 : vector<304x32xf32>
    %cst_11 = arith.constant 0.000000e+00 : f32
    %14 = vector.broadcast %cst_11 : f32 to vector<304x32xf32>
    %15 = arith.maximumf %13, %14 : vector<304x32xf32>
    %16 = arith.truncf %15 : vector<304x32xf32> to vector<304x32xbf16>
    %c0_12 = arith.constant 0 : index
    %c0_13 = arith.constant 0 : index
    %17 = vector.load %arg6[%c0_12, %c0_13] : memref<32x128xbf16, #tpu.memory_space<vmem>>, vector<32x128xbf16>
    %cst_14 = arith.constant dense<0.000000e+00> : vector<304x128xf32>
    %18 = tpu.matmul %16, %17, %cst_14 {dimension_numbers = #tpu.dot_dimension_numbers<[1], [0], [0], [1], [0, 0, 1, 1], [], []>} : vector<304x32xbf16>, vector<32x128xbf16>, vector<304x128xf32> -> vector<304x128xf32>
    %c0_15 = arith.constant 0 : index
    %c0_16 = arith.constant 0 : index
    %19 = vector.load %arg7[%c0_15, %c0_16] : memref<1x128xf32, #tpu.memory_space<vmem>>, vector<1x128xf32>
    %20 = vector.broadcast %19 : vector<1x128xf32> to vector<304x128xf32>
    %21 = arith.addf %18, %20 : vector<304x128xf32>
    %22 = math.tanh %21 : vector<304x128xf32>
    %23 = arith.truncf %22 : vector<304x128xf32> to vector<304x128xbf16>
    %c0_17 = arith.constant 0 : index
    %c0_18 = arith.constant 0 : index
    %24 = vector.load %arg8[%c0_17, %c0_18] : memref<304x128xbf16, #tpu.memory_space<vmem>>, vector<304x128xbf16>
    tpu.vector_store %arg8[%c0_17, %c0_18], %23 {strides = array<i32>} : memref<304x128xbf16, #tpu.memory_space<vmem>>, vector<304x128xbf16>,
    return
  }
  func.func @transform_0(%arg0: i32) -> (i32, i32) {
    %c0_i32 = arith.constant 0 : i32
    %c0_i32_0 = arith.constant 0 : i32
    return %arg0, %c0_i32 : i32, i32
  }
  func.func @transform_1(%arg0: i32) -> (i32, i32) {
    %c0_i32 = arith.constant 0 : i32
    %c0_i32_0 = arith.constant 0 : i32
    %c0_i32_1 = arith.constant 0 : i32
    return %c0_i32, %c0_i32_0 : i32, i32
  }
  func.func @transform_2(%arg0: i32) -> (i32, i32) {
    %c0_i32 = arith.constant 0 : i32
    %c0_i32_0 = arith.constant 0 : i32
    %c0_i32_1 = arith.constant 0 : i32
    return %c0_i32, %c0_i32_0 : i32, i32
  }
  func.func @transform_3(%arg0: i32) -> (i32, i32) {
    %c0_i32 = arith.constant 0 : i32
    %c0_i32_0 = arith.constant 0 : i32
    %c0_i32_1 = arith.constant 0 : i32
    return %c0_i32, %c0_i32_0 : i32, i32
  }
  func.func @transform_4(%arg0: i32) -> (i32, i32) {
    %c0_i32 = arith.constant 0 : i32
    %c0_i32_0 = arith.constant 0 : i32
    %c0_i32_1 = arith.constant 0 : i32
    return %c0_i32, %c0_i32_0 : i32, i32
  }
  func.func @transform_5(%arg0: i32) -> (i32, i32) {
    %c0_i32 = arith.constant 0 : i32
    %c0_i32_0 = arith.constant 0 : i32
    %c0_i32_1 = arith.constant 0 : i32
    return %c0_i32, %c0_i32_0 : i32, i32
  }
  func.func @transform_6(%arg0: i32) -> (i32, i32) {
    %c0_i32 = arith.constant 0 : i32
    %c0_i32_0 = arith.constant 0 : i32
    %c0_i32_1 = arith.constant 0 : i32
    return %c0_i32, %c0_i32_0 : i32, i32
  }
  func.func @transform_7(%arg0: i32) -> (i32, i32) {
    %c0_i32 = arith.constant 0 : i32
    %c0_i32_0 = arith.constant 0 : i32
    return %arg0, %c0_i32 : i32, i32
  }
}

</mosaic_0001>

<bundles_post_ra>
// kernel: tpu_custom_call.1
= control target key start
LH: loop header
LB: loop body
LE: loop exit
PB: predicated region body
PF: predicated region fallthrough
CT: control target
= control target key end

     0   :  { %v2012_v1 = vmov 0.0   ;;  %vm2013_vm0 = vmmov 0   ;;  %vm176_vm1 = vcmask 130048   ;;  %s2465_s0 = inlined_call_operand.vmem [shape: bf16[304,16], index: 0, kind: input, shape index: {}]   ;;  %s2466_s1 = inlined_call_operand.vmem [shape: bf16[16,32], index: 1, kind: input, shape index: {}]   ;;  %s2467_s2 = inlined_call_operand.vmem [shape: f32[1,32], index: 2, kind: input, shape index: {}]   ;;  %s2468_s3 = inlined_call_operand.vmem [shape: bf16[32,32], index: 3, kind: input, shape index: {}]   ;;  %s2469_s4 = inlined_call_operand.vmem [shape: f32[1,32], index: 4, kind: input, shape index: {}]   ;;  %s2470_s5 = inlined_call_operand.vmem [shape: bf16[32,128], index: 5, kind: input, shape index: {}]   ;;  %s2471_s6 = inlined_call_operand.vmem [shape: f32[1,128], index: 6, kind: input, shape index: {}]   ;;  %s2472_s7 = inlined_call_operand.hbm [shape: bf16[304,128], index: 7, kind: output, shape index: {}]  }
   0x1   :  { %v1888_v0 = vld [vmem:[%s2466_s1] sm:$0xff]   ;;  %1643 = vmatprep.subr.bf16.mxu0 %v2012_v1  ;;  %1881 = vmatprep.subr.bf16.mxu1 %v2012_v1  ;;  %v1890_v3 = vld [vmem:[%s2465_s0 + $0x8] sm:$0xff]   ;;  %v1899_v4 = vld [vmem:[%s2465_s0 + $0x50] sm:$0xff]  }
   0x2   :  { %v1889_v2 = vld [vmem:[%s2465_s0] sm:$0xff]   ;;  %1644 = vmatpush3.bf16.msra.mxu0 %v1888_v0  ;;  %1645 = vmatprep.mubr.msk.bf16.mxu0 %vm2013_vm0, %v2012_v1  ;;  %v1891_v5 = vld [vmem:[%s2465_s0 + $0x10] sm:$0xff]   ;;  %v1900_v6 = vld [vmem:[%s2465_s0 + $0x58] sm:$0xff]  }
   0x3   :  { %1882 = vmatpush3.bf16.msra.mxu1 %v1888_v0  ;;  %1685 = vmatprep.mubr.msk.bf16.mxu1 %vm2013_vm0, %v2012_v1  ;;  %v1908_v7 = vld [vmem:[%s2468_s3] sm:$0xff]   ;;  %v1909_v8 = vld [vmem:[%s2468_s3 + $0x8] sm:$0xff]  }
   0x4   :  { %1721 = vmatprep.subr.bf16.mxu1 %v2012_v1  ;;  %1801 = vmatprep.subr.bf16.mxu0 %v2012_v1 }
   0x5   :  { %1646 = vmatmul.mubr.msk.bf16.vlgmr.msra.gmra.mrb[0].mxu0 %vm176_vm1, %v1889_v2 }
   0x6   :  { %1649 = vmatprep.mubr.msk.bf16.mxu0 %vm2013_vm0, %v2012_v1  ;;  %1686 = vmatmul.mubr.msk.bf16.vlgmr.msra.gmra.mrb[0].mxu1 %vm176_vm1, %v1899_v4 }
   0x7   :  { %1689 = vmatprep.mubr.msk.bf16.mxu1 %vm2013_vm0, %v2012_v1  ;;  %1722 = vmatpush3.bf16.msra.mxu1 %v1908_v7 }
   0xd   :  { %1650 = vmatmul.mubr.msk.bf16.gmra.mrb[4].mxu0 %vm176_vm1, %v1890_v3 }
   0xe   :  { %1653 = vmatprep.mubr.msk.bf16.mxu0 %vm2013_vm0, %v2012_v1  ;;  %1690 = vmatmul.mubr.msk.bf16.gmra.mrb[4].mxu1 %vm176_vm1, %v1900_v6 }
   0xf   :  { %1693 = vmatprep.mubr.msk.bf16.mxu1 %vm2013_vm0, %v2012_v1 }
  0x15   :  { %1654 = vmatmul.mubr.msk.bf16.gmra.mrb[8].mxu0 %vm176_vm1, %v1891_v5 }
  0x16   :  { %1657 = vmatprep.mubr.msk.bf16.mxu0 %vm2013_vm0, %v2012_v1 }
  0x17   :  { %12 = vsyncpa [#allocation3], 0  ;;  %1723 = vmatprep.subr.bf16.mxu1 %v2012_v1  ;;  %v1892_v9 = vld [vmem:[%s2465_s0 + $0x18] sm:$0xff]   ;;  %v1901_v10 = vld [vmem:[%s2465_s0 + $0x60] sm:$0xff]   ;;  %vm499_vm2 = vcmask 261120  }
  0x18   :  { %1724 = vmatpush3.bf16.msra.mxu1 %v1909_v8  ;;  %v1893_v11 = vld [vmem:[%s2465_s0 + $0x20] sm:$0xff]   ;;  %v1902_v12 = vld [vmem:[%s2465_s0 + $0x68] sm:$0xff]   ;;  %v1903_v14 = vld [vmem:[%s2465_s0 + $0x70] sm:$0xff]  }
  0x19   :  { %1694 = vmatmul.mubr.msk.bf16.gmra.mrb[8].mxu1 %vm176_vm1, %v1901_v10  ;;  %v1894_v13 = vld [vmem:[%s2465_s0 + $0x28] sm:$0xff]   ;;  %v1895_v15 = vld [vmem:[%s2465_s0 + $0x30] sm:$0xff]   ;;  %v1904_v16 = vld [vmem:[%s2465_s0 + $0x78] sm:$0xff]  }
  0x1a   :  { %1697 = vmatprep.mubr.msk.bf16.mxu1 %vm2013_vm0, %v2012_v1  ;;  %v1896_v17 = vld [vmem:[%s2465_s0 + $0x38] sm:$0xff]   ;;  %v1905_v18 = vld [vmem:[%s2465_s0 + $0x80] sm:$0xff]   ;;  %v1906_v20 = vld [vmem:[%s2465_s0 + $0x88] sm:$0xff]  }
  0x1b   :  { %v1897_v19 = vld [vmem:[%s2465_s0 + $0x40] sm:$0xff]   ;;  %v1898_v21 = vld [vmem:[%s2465_s0 + $0x48] sm:$0xff]   ;;  %v1907_v22 = vld [vmem:[%s2465_s0 + $0x90] sm:$0xff]  }
  0x1c   :  { %v2192_v23 = vld [vmem:[%s2467_s2] ss:$0 sm:$0xff] }
  0x1d   :  { %1658 = vmatmul.mubr.msk.bf16.gmra.mrb[12].mxu0 %vm176_vm1, %v1892_v9  ;;  %v1910_v57 = vld [vmem:[%s2470_s5] sm:$0xff]  }
  0x1e   :  { %1661 = vmatprep.mubr.msk.bf16.mxu0 %vm2013_vm0, %v2012_v1  ;;  %1802 = vmatpush3.bf16.msra.mxu0 %v1910_v57 }
  0x1f   :  { %1803 = vmatprep.subr.bf16.mxu0 %v2012_v1 }
  0x21   :  { %1698 = vmatmul.mubr.msk.bf16.gmra.mrb[12].mxu1 %vm176_vm1, %v1902_v12 }
  0x22   :  { %1701 = vmatprep.mubr.msk.bf16.mxu1 %vm2013_vm0, %v2012_v1 }
  0x25   :  { %1662 = vmatmul.mubr.msk.bf16.gmra.mrb[16].mxu0 %vm176_vm1, %v1893_v11 }
  0x26   :  { %1665 = vmatprep.mubr.msk.bf16.mxu0 %vm2013_vm0, %v2012_v1 }
  0x29   :  { %1702 = vmatmul.mubr.msk.bf16.gmra.mrb[16].mxu1 %vm176_vm1, %v1903_v14 }
  0x2a   :  { %1705 = vmatprep.mubr.msk.bf16.mxu1 %vm2013_vm0, %v2012_v1 }
  0x2d   :  { %1666 = vmatmul.mubr.msk.bf16.gmra.mrb[20].mxu0 %vm176_vm1, %v1894_v13  ;;  %v1911_v13 = vld [vmem:[%s2470_s5 + $0x8] sm:$0xff]  }
  0x2e   :  { %1669 = vmatprep.mubr.msk.bf16.mxu0 %vm2013_vm0, %v2012_v1  ;;  %1804 = vmatpush3.bf16.msra.mxu0 %v1911_v13 }
  0x31   :  { %1706 = vmatmul.mubr.msk.bf16.gmra.mrb[20].mxu1 %vm176_vm1, %v1904_v16 }
  0x32   :  { %1709 = vmatprep.mubr.msk.bf16.mxu1 %vm2013_vm0, %v2012_v1 }
  0x35   :  { %1670 = vmatmul.mubr.msk.bf16.gmra.mrb[24].mxu0 %vm176_vm1, %v1895_v15 }
  0x36   :  { %1673 = vmatprep.mubr.msk.bf16.mxu0 %vm2013_vm0, %v2012_v1 }
  0x39   :  { %1710 = vmatmul.mubr.msk.bf16.gmra.mrb[24].mxu1 %vm176_vm1, %v1905_v18 }
  0x3a   :  { %1713 = vmatprep.mubr.msk.bf16.mxu1 %vm2013_vm0, %v2012_v1 }
  0x3d   :  { %1674 = vmatmul.mubr.msk.bf16.gmra.mrb[28].mxu0 %vm176_vm1, %v1896_v17 }
  0x3e   :  { %1677 = vmatprep.mubr.msk.bf16.mxu0 %vm2013_vm0, %v2012_v1 }
  0x41   :  { %1714 = vmatmul.mubr.msk.bf16.gmra.mrb[28].mxu1 %vm176_vm1, %v1906_v20 }
  0x42   :  { %1717 = vmatprep.mubr.msk.bf16.mxu1 %vm2013_vm0, %v2012_v1 }
  0x45   :  { %1678 = vmatmul.mubr.msk.bf16.gmra.mrb[32].mxu0 %vm176_vm1, %v1897_v19 }
  0x46   :  { %1681 = vmatprep.mubr.msk.bf16.mxu0 %vm2013_vm0, %v2012_v1 }
  0x49   :  { %1718 = vmatmul.mubr.msk.bf16.gmra.mrb[32].mxu1 %vm176_vm1, %v1907_v22 }
  0x4a   :  { %1725 = vmatprep.mubr.msk.bf16.mxu1 %vm2013_vm0, %v2012_v1 }
  0x4d   :  { %1682 = vmatmul.mubr.msk.bf16.gmra.mrb[36].mxu0 %vm176_vm1, %v1898_v21 }
  0x4e   :  { %1805 = vmatprep.mubr.msk.bf16.mxu0 %vm2013_vm0, %v2012_v1 }
  0xd8   :  { %v268_v24 = vpop.f32.mrb[0].mxu0 }
  0xd9   :  { %v269_v25 = vadd.f32 %v2192_v23, %v268_v24  ;;  %v1647_v26 = vpop.f32.mrb[1].mxu0  ;;  %v348_v34 = vpop.f32.mrb[0].mxu1 }
  0xda   :  { %v271_v27 = vpop.f32.mrb[2].mxu0  ;;  %v349_v37 = vadd.f32 %v2192_v23, %v348_v34  ;;  %v1687_v38 = vpop.f32.mrb[1].mxu1 }
  0xdb   :  { %v272_v28 = vadd.f32 %v2192_v23, %v271_v27  ;;  %v1648_v29 = vpop.f32.mrb[3].mxu0  ;;  %v419_v30 = vmax.f32 %v269_v25, 0.0  ;;  %v351_v40 = vpop.f32.mrb[2].mxu1 }
  0xdc   :  { %v439_v43 = vmax.f32 %v349_v37, 0.0  ;;  %v352_v44 = vadd.f32 %v2192_v23, %v351_v40  ;;  %v1688_v45 = vpop.f32.mrb[3].mxu1 }
  0xdd   :  { %v420_v31 = vmax.f32 %v272_v28, 0.0 }
  0xde   :  { %v440_v48 = vmax.f32 %v352_v44, 0.0 }
  0xdf   :  { %v457_v32 = vpack.c.bf16 %v420_v31, %v419_v30 }
  0xe0   :  { %v276_v33 = vpop.f32.mrb[4].mxu0  ;;  %v2203_v50 = vpack.c.bf16 %v440_v48, %v439_v43 }
  0xe1   :  { %v277_v35 = vadd.f32 %v2192_v23, %v276_v33  ;;  %v1651_v36 = vpop.f32.mrb[5].mxu0  ;;  %1726 = vmatmul.mubr.msk.bf16.vlgmr.msra.gmra.mrb[36].mxu1 %vm499_vm2, %v457_v32  ;;  %v356_v52 = vpop.f32.mrb[4].mxu1 }
  0xe2   :  { %v279_v39 = vpop.f32.mrb[6].mxu0  ;;  %1729 = vmatprep.mubr.msk.bf16.mxu1 %vm2013_vm0, %v2012_v1  ;;  %v357_v55 = vadd.f32 %v2192_v23, %v356_v52  ;;  %v1691_v56 = vpop.f32.mrb[5].mxu1 }
  0xe3   :  { %v280_v41 = vadd.f32 %v2192_v23, %v279_v39  ;;  %v1652_v42 = vpop.f32.mrb[7].mxu0  ;;  %v421_v46 = vmax.f32 %v277_v35, 0.0  ;;  %v359_v59 = vpop.f32.mrb[6].mxu1 }
  0xe4   :  { %v441_v62 = vmax.f32 %v357_v55, 0.0  ;;  %v360_v63 = vadd.f32 %v2192_v23, %v359_v59  ;;  %v1692_v0 = vpop.f32.mrb[7].mxu1 }
  0xe5   :  { %v422_v47 = vmax.f32 %v280_v41, 0.0 }
  0xe6   :  { %v442_v4 = vmax.f32 %v360_v63, 0.0 }
  0xe7   :  { %v458_v49 = vpack.c.bf16 %v422_v47, %v421_v46 }
  0xe8   :  { %v284_v51 = vpop.f32.mrb[8].mxu0  ;;  %v2216_v6 = vpack.c.bf16 %v442_v4, %v441_v62 }
  0xe9   :  { %v285_v53 = vadd.f32 %v2192_v23, %v284_v51  ;;  %v1655_v54 = vpop.f32.mrb[9].mxu0  ;;  %1730 = vmatmul.mubr.msk.bf16.gmra.mrb[40].mxu1 %vm499_vm2, %v458_v49 }
  0xea   :  { %v287_v58 = vpop.f32.mrb[10].mxu0  ;;  %1733 = vmatprep.mubr.msk.bf16.mxu1 %vm2013_vm0, %v2012_v1 }
  0xeb   :  { %v288_v60 = vadd.f32 %v2192_v23, %v287_v58  ;;  %v1656_v61 = vpop.f32.mrb[11].mxu0  ;;  %v423_v2 = vmax.f32 %v285_v53, 0.0 }
  0xec   :  { %v364_v8 = vpop.f32.mrb[8].mxu1 }
  0xed   :  { %v424_v3 = vmax.f32 %v288_v60, 0.0  ;;  %v365_v11 = vadd.f32 %v2192_v23, %v364_v8  ;;  %v1695_v12 = vpop.f32.mrb[9].mxu1 }
  0xee   :  { %v367_v15 = vpop.f32.mrb[10].mxu1 }
  0xef   :  { %v459_v5 = vpack.c.bf16 %v424_v3, %v423_v2  ;;  %v443_v18 = vmax.f32 %v365_v11, 0.0  ;;  %v368_v19 = vadd.f32 %v2192_v23, %v367_v15  ;;  %v1696_v20 = vpop.f32.mrb[11].mxu1 }
  0xf0   :  { %v292_v7 = vpop.f32.mrb[12].mxu0 }
  0xf1   :  { %v293_v9 = vadd.f32 %v2192_v23, %v292_v7  ;;  %v1659_v10 = vpop.f32.mrb[13].mxu0  ;;  %1734 = vmatmul.mubr.msk.bf16.gmra.mrb[44].mxu1 %vm499_vm2, %v459_v5  ;;  %v444_v24 = vmax.f32 %v368_v19, 0.0 }
  0xf2   :  { %v295_v14 = vpop.f32.mrb[14].mxu0  ;;  %1737 = vmatprep.mubr.msk.bf16.mxu1 %vm2013_vm0, %v2012_v1 }
  0xf3   :  { %v296_v16 = vadd.f32 %v2192_v23, %v295_v14  ;;  %v1660_v17 = vpop.f32.mrb[15].mxu0  ;;  %v425_v21 = vmax.f32 %v293_v9, 0.0  ;;  %v2228_v26 = vpack.c.bf16 %v444_v24, %v443_v18 }
  0xf4   :  { %v372_v28 = vpop.f32.mrb[12].mxu1 }
  0xf5   :  { %v426_v22 = vmax.f32 %v296_v16, 0.0  ;;  %v373_v31 = vadd.f32 %v2192_v23, %v372_v28  ;;  %v1699_v32 = vpop.f32.mrb[13].mxu1 }
  0xf6   :  { %v375_v34 = vpop.f32.mrb[14].mxu1 }
  0xf7   :  { %v460_v25 = vpack.c.bf16 %v426_v22, %v425_v21  ;;  %v445_v37 = vmax.f32 %v373_v31, 0.0  ;;  %v376_v38 = vadd.f32 %v2192_v23, %v375_v34  ;;  %v1700_v39 = vpop.f32.mrb[15].mxu1 }
  0xf8   :  { %v300_v27 = vpop.f32.mrb[16].mxu0 }
  0xf9   :  { %v301_v29 = vadd.f32 %v2192_v23, %v300_v27  ;;  %v1663_v30 = vpop.f32.mrb[17].mxu0  ;;  %1738 = vmatmul.mubr.msk.bf16.gmra.mrb[48].mxu1 %vm499_vm2, %v460_v25  ;;  %v446_v42 = vmax.f32 %v376_v38, 0.0 }
  0xfa   :  { %v303_v33 = vpop.f32.mrb[18].mxu0  ;;  %1741 = vmatprep.mubr.msk.bf16.mxu1 %vm2013_vm0, %v2012_v1 }
  0xfb   :  { %v304_v35 = vadd.f32 %v2192_v23, %v303_v33  ;;  %v1664_v36 = vpop.f32.mrb[19].mxu0  ;;  %v427_v40 = vmax.f32 %v301_v29, 0.0  ;;  %v2237_v44 = vpack.c.bf16 %v446_v42, %v445_v37 }
  0xfc   :  { %v380_v46 = vpop.f32.mrb[16].mxu1 }
  0xfd   :  { %v428_v41 = vmax.f32 %v304_v35, 0.0  ;;  %v381_v49 = vadd.f32 %v2192_v23, %v380_v46  ;;  %v1703_v51 = vpop.f32.mrb[17].mxu1 }
  0xfe   :  { %v383_v53 = vpop.f32.mrb[18].mxu1 }
  0xff   :  { %v461_v43 = vpack.c.bf16 %v428_v41, %v427_v40  ;;  %v447_v56 = vmax.f32 %v381_v49, 0.0  ;;  %v384_v57 = vadd.f32 %v2192_v23, %v383_v53  ;;  %v1704_v58 = vpop.f32.mrb[19].mxu1 }
 0x100   :  { %v308_v45 = vpop.f32.mrb[20].mxu0 }
 0x101   :  { %v309_v47 = vadd.f32 %v2192_v23, %v308_v45  ;;  %v1667_v48 = vpop.f32.mrb[21].mxu0  ;;  %1742 = vmatmul.mubr.msk.bf16.gmra.mrb[52].mxu1 %vm499_vm2, %v461_v43  ;;  %v448_v61 = vmax.f32 %v384_v57, 0.0 }
 0x102   :  { %v311_v52 = vpop.f32.mrb[22].mxu0  ;;  %1745 = vmatprep.mubr.msk.bf16.mxu1 %vm2013_vm0, %v2012_v1 }
 0x103   :  { %v312_v54 = vadd.f32 %v2192_v23, %v311_v52  ;;  %v1668_v55 = vpop.f32.mrb[23].mxu0  ;;  %v429_v59 = vmax.f32 %v309_v47, 0.0  ;;  %v2246_v63 = vpack.c.bf16 %v448_v61, %v447_v56 }
 0x104   :  { %v388_v2 = vpop.f32.mrb[20].mxu1 }
 0x105   :  { %v430_v60 = vmax.f32 %v312_v54, 0.0  ;;  %v389_v5 = vadd.f32 %v2192_v23, %v388_v2  ;;  %v1707_v7 = vpop.f32.mrb[21].mxu1 }
 0x106   :  { %v391_v9 = vpop.f32.mrb[22].mxu1 }
 0x107   :  { %v462_v62 = vpack.c.bf16 %v430_v60, %v429_v59  ;;  %v449_v12 = vmax.f32 %v389_v5, 0.0  ;;  %v392_v13 = vadd.f32 %v2192_v23, %v391_v9  ;;  %v1708_v14 = vpop.f32.mrb[23].mxu1 }
 0x108   :  { %v316_v0 = vpop.f32.mrb[24].mxu0 }
 0x109   :  { %v317_v3 = vadd.f32 %v2192_v23, %v316_v0  ;;  %v1671_v4 = vpop.f32.mrb[25].mxu0  ;;  %1746 = vmatmul.mubr.msk.bf16.gmra.mrb[56].mxu1 %vm499_vm2, %v462_v62  ;;  %v450_v17 = vmax.f32 %v392_v13, 0.0 }
 0x10a   :  { %v319_v8 = vpop.f32.mrb[26].mxu0  ;;  %1749 = vmatprep.mubr.msk.bf16.mxu1 %vm2013_vm0, %v2012_v1 }
 0x10b   :  { %v320_v10 = vadd.f32 %v2192_v23, %v319_v8  ;;  %v1672_v11 = vpop.f32.mrb[27].mxu0  ;;  %v431_v15 = vmax.f32 %v317_v3, 0.0  ;;  %v2255_v19 = vpack.c.bf16 %v450_v17, %v449_v12 }
 0x10c   :  { %v396_v21 = vpop.f32.mrb[24].mxu1 }
 0x10d   :  { %v432_v16 = vmax.f32 %v320_v10, 0.0  ;;  %v397_v25 = vadd.f32 %v2192_v23, %v396_v21  ;;  %v1711_v27 = vpop.f32.mrb[25].mxu1 }
 0x10e   :  { %v399_v29 = vpop.f32.mrb[26].mxu1 }
 0x10f   :  { %v463_v18 = vpack.c.bf16 %v432_v16, %v431_v15  ;;  %v451_v32 = vmax.f32 %v397_v25, 0.0  ;;  %v400_v33 = vadd.f32 %v2192_v23, %v399_v29  ;;  %v1712_v34 = vpop.f32.mrb[27].mxu1 }
 0x110   :  { %v324_v20 = vpop.f32.mrb[28].mxu0 }
 0x111   :  { %v325_v22 = vadd.f32 %v2192_v23, %v324_v20  ;;  %v1675_v24 = vpop.f32.mrb[29].mxu0  ;;  %1750 = vmatmul.mubr.msk.bf16.gmra.mrb[60].mxu1 %vm499_vm2, %v463_v18  ;;  %v452_v37 = vmax.f32 %v400_v33, 0.0 }
 0x112   :  { %v327_v28 = vpop.f32.mrb[30].mxu0  ;;  %1753 = vmatprep.mubr.msk.bf16.mxu1 %vm2013_vm0, %v2012_v1 }
 0x113   :  { %v328_v30 = vadd.f32 %v2192_v23, %v327_v28  ;;  %v1676_v31 = vpop.f32.mrb[31].mxu0  ;;  %v433_v35 = vmax.f32 %v325_v22, 0.0  ;;  %v473_v39 = vpack.c.bf16 %v452_v37, %v451_v32 }
 0x114   :  { %v404_v41 = vpop.f32.mrb[28].mxu1 }
 0x115   :  { %v434_v36 = vmax.f32 %v328_v30, 0.0  ;;  %v405_v45 = vadd.f32 %v2192_v23, %v404_v41  ;;  %v1715_v46 = vpop.f32.mrb[29].mxu1 }
 0x116   :  { %v407_v48 = vpop.f32.mrb[30].mxu1 }
 0x117   :  { %v464_v38 = vpack.c.bf16 %v434_v36, %v433_v35  ;;  %v453_v52 = vmax.f32 %v405_v45, 0.0  ;;  %v408_v53 = vadd.f32 %v2192_v23, %v407_v48  ;;  %v1716_v54 = vpop.f32.mrb[31].mxu1 }
 0x118   :  { %v332_v40 = vpop.f32.mrb[32].mxu0 }
 0x119   :  { %v333_v42 = vadd.f32 %v2192_v23, %v332_v40  ;;  %v1679_v43 = vpop.f32.mrb[33].mxu0  ;;  %1754 = vmatmul.mubr.msk.bf16.gmra.mrb[64].mxu1 %vm499_vm2, %v464_v38  ;;  %v454_v57 = vmax.f32 %v408_v53, 0.0 }
 0x11a   :  { %v335_v47 = vpop.f32.mrb[34].mxu0  ;;  %1757 = vmatprep.mubr.msk.bf16.mxu1 %vm2013_vm0, %v2012_v1 }
 0x11b   :  { %v336_v49 = vadd.f32 %v2192_v23, %v335_v47  ;;  %v1680_v51 = vpop.f32.mrb[35].mxu0  ;;  %v435_v55 = vmax.f32 %v333_v42, 0.0  ;;  %v474_v59 = vpack.c.bf16 %v454_v57, %v453_v52 }
 0x11c   :  { %v412_v61 = vpop.f32.mrb[32].mxu1 }
 0x11d   :  { %v436_v56 = vmax.f32 %v336_v49, 0.0  ;;  %v413_v2 = vadd.f32 %v2192_v23, %v412_v61  ;;  %v1719_v3 = vpop.f32.mrb[33].mxu1 }
 0x11e   :  { %v415_v5 = vpop.f32.mrb[34].mxu1 }
 0x11f   :  { %v465_v58 = vpack.c.bf16 %v436_v56, %v435_v55  ;;  %v455_v9 = vmax.f32 %v413_v2, 0.0  ;;  %v416_v10 = vadd.f32 %v2192_v23, %v415_v5  ;;  %v1720_v11 = vpop.f32.mrb[35].mxu1 }
 0x120   :  { %v340_v60 = vpop.f32.mrb[36].mxu0 }
 0x121   :  { %v341_v62 = vadd.f32 %v2192_v23, %v340_v60  ;;  %v1683_v0 = vpop.f32.mrb[37].mxu0  ;;  %1758 = vmatmul.mubr.msk.bf16.gmra.mrb[68].mxu1 %vm499_vm2, %v465_v58  ;;  %v456_v14 = vmax.f32 %v416_v10, 0.0 }
 0x122   :  { %v343_v4 = vpop.f32.mrb[38].mxu0  ;;  %1761 = vmatprep.mubr.msk.bf16.mxu1 %vm2013_vm0, %v2012_v1 }
 0x123   :  { %v344_v7 = vadd.f32 %v2192_v23, %v343_v4  ;;  %v1684_v8 = vpop.f32.mrb[39].mxu0  ;;  %v437_v12 = vmax.f32 %v341_v62, 0.0  ;;  %v475_v16 = vpack.c.bf16 %v456_v14, %v455_v9  ;;  %v2315_v23 = vld [vmem:[%s2469_s4] ss:$0 sm:$0xff] }
 0x125   :  { %v438_v13 = vmax.f32 %v344_v7, 0.0 }
 0x127   :  { %v466_v15 = vpack.c.bf16 %v438_v13, %v437_v12 }
 0x129   :  { %1762 = vmatmul.mubr.msk.bf16.gmra.mrb[72].mxu1 %vm499_vm2, %v466_v15 }
 0x12a   :  { %1765 = vmatprep.mubr.msk.bf16.mxu1 %vm2013_vm0, %v2012_v1 }
 0x131   :  { %1766 = vmatmul.mubr.msk.bf16.gmra.mrb[76].mxu1 %vm499_vm2, %v2203_v50 }
 0x132   :  { %1769 = vmatprep.mubr.msk.bf16.mxu1 %vm2013_vm0, %v2012_v1 }
 0x139   :  { %1770 = vmatmul.mubr.msk.bf16.gmra.mrb[80].mxu1 %vm499_vm2, %v2216_v6 }
 0x13a   :  { %1773 = vmatprep.mubr.msk.bf16.mxu1 %vm2013_vm0, %v2012_v1 }
 0x141   :  { %1774 = vmatmul.mubr.msk.bf16.gmra.mrb[84].mxu1 %vm499_vm2, %v2228_v26 }
 0x142   :  { %1777 = vmatprep.mubr.msk.bf16.mxu1 %vm2013_vm0, %v2012_v1 }
 0x149   :  { %1778 = vmatmul.mubr.msk.bf16.gmra.mrb[88].mxu1 %vm499_vm2, %v2237_v44 }
 0x14a   :  { %1781 = vmatprep.mubr.msk.bf16.mxu1 %vm2013_vm0, %v2012_v1 }
 0x151   :  { %1782 = vmatmul.mubr.msk.bf16.gmra.mrb[92].mxu1 %vm499_vm2, %v2246_v63 }
 0x152   :  { %1785 = vmatprep.mubr.msk.bf16.mxu1 %vm2013_vm0, %v2012_v1 }
 0x159   :  { %1786 = vmatmul.mubr.msk.bf16.gmra.mrb[96].mxu1 %vm499_vm2, %v2255_v19 }
 0x15a   :  { %1789 = vmatprep.mubr.msk.bf16.mxu1 %vm2013_vm0, %v2012_v1 }
 0x161   :  { %1790 = vmatmul.mubr.msk.bf16.gmra.mrb[100].mxu1 %vm499_vm2, %v473_v39 }
 0x162   :  { %1793 = vmatprep.mubr.msk.bf16.mxu1 %vm2013_vm0, %v2012_v1 }
 0x169   :  { %1794 = vmatmul.mubr.msk.bf16.gmra.mrb[104].mxu1 %vm499_vm2, %v474_v59 }
 0x16a   :  { %1797 = vmatprep.mubr.msk.bf16.mxu1 %vm2013_vm0, %v2012_v1 }
 0x171   :  { %1798 = vmatmul.mubr.msk.bf16.gmra.mrb[108].mxu1 %vm499_vm2, %v475_v16 }
 0x1b4   :  { %v591_v50 = vpop.f32.mrb[36].mxu1 }
 0x1b5   :  { %v592_v6 = vadd.f32 %v2315_v23, %v591_v50  ;;  %v1727_v26 = vpop.f32.mrb[37].mxu1 }
 0x1b6   :  { %v594_v44 = vpop.f32.mrb[38].mxu1 }
 0x1b7   :  { %v595_v63 = vadd.f32 %v2315_v23, %v594_v44  ;;  %v1728_v17 = vpop.f32.mrb[39].mxu1  ;;  %v742_v18 = vmax.f32 %v592_v6, 0.0 }
 0x1b9   :  { %v743_v19 = vmax.f32 %v595_v63, 0.0 }
 0x1bb   :  { %v780_v20 = vpack.c.bf16 %v743_v19, %v742_v18 }
 0x1bc   :  { %v599_v21 = vpop.f32.mrb[40].mxu1 }
 0x1bd   :  { %v600_v22 = vadd.f32 %v2315_v23, %v599_v21  ;;  %v1731_v24 = vpop.f32.mrb[41].mxu1  ;;  %1806 = vmatmul.mubr.msk.bf16.vlgmr.msra.gmra.mrb[40].mxu0 %vm499_vm2, %v780_v20 }
 0x1be   :  { %v602_v25 = vpop.f32.mrb[42].mxu1  ;;  %1809 = vmatprep.mubr.msk.bf16.mxu0 %vm2013_vm0, %v2012_v1 }
 0x1bf   :  { %v603_v27 = vadd.f32 %v2315_v23, %v602_v25  ;;  %v1732_v28 = vpop.f32.mrb[43].mxu1  ;;  %v744_v29 = vmax.f32 %v600_v22, 0.0 }
 0x1c1   :  { %v745_v30 = vmax.f32 %v603_v27, 0.0 }
 0x1c3   :  { %v781_v31 = vpack.c.bf16 %v745_v30, %v744_v29 }
 0x1c4   :  { %v607_v32 = vpop.f32.mrb[44].mxu1 }
 0x1c5   :  { %v608_v33 = vadd.f32 %v2315_v23, %v607_v32  ;;  %v1735_v34 = vpop.f32.mrb[45].mxu1  ;;  %1810 = vmatmul.mubr.msk.bf16.gmra.mrb[44].mxu0 %vm499_vm2, %v781_v31 }
 0x1c6   :  { %v610_v35 = vpop.f32.mrb[46].mxu1  ;;  %1813 = vmatprep.mubr.msk.bf16.mxu0 %vm2013_vm0, %v2012_v1 }
 0x1c7   :  { %v611_v36 = vadd.f32 %v2315_v23, %v610_v35  ;;  %v1736_v37 = vpop.f32.mrb[47].mxu1  ;;  %v746_v38 = vmax.f32 %v608_v33, 0.0 }
 0x1c9   :  { %v747_v39 = vmax.f32 %v611_v36, 0.0 }
 0x1cb   :  { %v782_v40 = vpack.c.bf16 %v747_v39, %v746_v38 }
 0x1cc   :  { %v615_v41 = vpop.f32.mrb[48].mxu1 }
 0x1cd   :  { %v616_v42 = vadd.f32 %v2315_v23, %v615_v41  ;;  %v1739_v43 = vpop.f32.mrb[49].mxu1  ;;  %1814 = vmatmul.mubr.msk.bf16.gmra.mrb[48].mxu0 %vm499_vm2, %v782_v40 }
 0x1ce   :  { %v618_v45 = vpop.f32.mrb[50].mxu1  ;;  %1817 = vmatprep.mubr.msk.bf16.mxu0 %vm2013_vm0, %v2012_v1 }
 0x1cf   :  { %v619_v46 = vadd.f32 %v2315_v23, %v618_v45  ;;  %v1740_v47 = vpop.f32.mrb[51].mxu1  ;;  %v748_v48 = vmax.f32 %v616_v42, 0.0 }
 0x1d1   :  { %v749_v49 = vmax.f32 %v619_v46, 0.0 }
 0x1d3   :  { %v783_v51 = vpack.c.bf16 %v749_v49, %v748_v48 }
 0x1d4   :  { %v623_v52 = vpop.f32.mrb[52].mxu1 }
 0x1d5   :  { %v624_v53 = vadd.f32 %v2315_v23, %v623_v52  ;;  %v1743_v54 = vpop.f32.mrb[53].mxu1  ;;  %1818 = vmatmul.mubr.msk.bf16.gmra.mrb[52].mxu0 %vm499_vm2, %v783_v51 }
 0x1d6   :  { %v626_v55 = vpop.f32.mrb[54].mxu1  ;;  %1821 = vmatprep.mubr.msk.bf16.mxu0 %vm2013_vm0, %v2012_v1 }
 0x1d7   :  { %v627_v56 = vadd.f32 %v2315_v23, %v626_v55  ;;  %v1744_v57 = vpop.f32.mrb[55].mxu1  ;;  %v750_v58 = vmax.f32 %v624_v53, 0.0 }
 0x1d9   :  { %v751_v59 = vmax.f32 %v627_v56, 0.0 }
 0x1db   :  { %v784_v60 = vpack.c.bf16 %v751_v59, %v750_v58 }
 0x1dc   :  { %v631_v61 = vpop.f32.mrb[56].mxu1 }
 0x1dd   :  { %v632_v62 = vadd.f32 %v2315_v23, %v631_v61  ;;  %v1747_v0 = vpop.f32.mrb[57].mxu1  ;;  %1822 = vmatmul.mubr.msk.bf16.gmra.mrb[56].mxu0 %vm499_vm2, %v784_v60 }
 0x1de   :  { %v634_v2 = vpop.f32.mrb[58].mxu1  ;;  %1825 = vmatprep.mubr.msk.bf16.mxu0 %vm2013_vm0, %v2012_v1 }
 0x1df   :  { %v635_v3 = vadd.f32 %v2315_v23, %v634_v2  ;;  %v1748_v4 = vpop.f32.mrb[59].mxu1  ;;  %v752_v5 = vmax.f32 %v632_v62, 0.0 }
 0x1e1   :  { %v753_v7 = vmax.f32 %v635_v3, 0.0 }
 0x1e3   :  { %v785_v8 = vpack.c.bf16 %v753_v7, %v752_v5 }
 0x1e4   :  { %v639_v9 = vpop.f32.mrb[60].mxu1 }
 0x1e5   :  { %v640_v10 = vadd.f32 %v2315_v23, %v639_v9  ;;  %v1751_v11 = vpop.f32.mrb[61].mxu1  ;;  %1826 = vmatmul.mubr.msk.bf16.gmra.mrb[60].mxu0 %vm499_vm2, %v785_v8 }
 0x1e6   :  { %v642_v12 = vpop.f32.mrb[62].mxu1  ;;  %1829 = vmatprep.mubr.msk.bf16.mxu0 %vm2013_vm0, %v2012_v1 }
 0x1e7   :  { %v643_v13 = vadd.f32 %v2315_v23, %v642_v12  ;;  %v1752_v14 = vpop.f32.mrb[63].mxu1  ;;  %v754_v15 = vmax.f32 %v640_v10, 0.0 }
 0x1e9   :  { %v755_v16 = vmax.f32 %v643_v13, 0.0 }
 0x1eb   :  { %v786_v50 = vpack.c.bf16 %v755_v16, %v754_v15 }
 0x1ec   :  { %v647_v6 = vpop.f32.mrb[64].mxu1 }
 0x1ed   :  { %v648_v26 = vadd.f32 %v2315_v23, %v647_v6  ;;  %v1755_v44 = vpop.f32.mrb[65].mxu1  ;;  %1830 = vmatmul.mubr.msk.bf16.gmra.mrb[64].mxu0 %vm499_vm2, %v786_v50 }
 0x1ee   :  { %v650_v63 = vpop.f32.mrb[66].mxu1  ;;  %1833 = vmatprep.mubr.msk.bf16.mxu0 %vm2013_vm0, %v2012_v1 }
 0x1ef   :  { %v651_v17 = vadd.f32 %v2315_v23, %v650_v63  ;;  %v1756_v18 = vpop.f32.mrb[67].mxu1  ;;  %v756_v19 = vmax.f32 %v648_v26, 0.0 }
 0x1f1   :  { %v757_v20 = vmax.f32 %v651_v17, 0.0 }
 0x1f3   :  { %v787_v21 = vpack.c.bf16 %v757_v20, %v756_v19 }
 0x1f4   :  { %v655_v22 = vpop.f32.mrb[68].mxu1 }
 0x1f5   :  { %v656_v24 = vadd.f32 %v2315_v23, %v655_v22  ;;  %v1759_v25 = vpop.f32.mrb[69].mxu1  ;;  %1834 = vmatmul.mubr.msk.bf16.gmra.mrb[68].mxu0 %vm499_vm2, %v787_v21 }
 0x1f6   :  { %v658_v27 = vpop.f32.mrb[70].mxu1  ;;  %1837 = vmatprep.mubr.msk.bf16.mxu0 %vm2013_vm0, %v2012_v1 }
 0x1f7   :  { %v659_v28 = vadd.f32 %v2315_v23, %v658_v27  ;;  %v1760_v29 = vpop.f32.mrb[71].mxu1  ;;  %v758_v30 = vmax.f32 %v656_v24, 0.0 }
 0x1f9   :  { %v759_v31 = vmax.f32 %v659_v28, 0.0 }
 0x1fb   :  { %v788_v32 = vpack.c.bf16 %v759_v31, %v758_v30 }
 0x1fc   :  { %v663_v33 = vpop.f32.mrb[72].mxu1 }
 0x1fd   :  { %v664_v34 = vadd.f32 %v2315_v23, %v663_v33  ;;  %v1763_v35 = vpop.f32.mrb[73].mxu1  ;;  %1838 = vmatmul.mubr.msk.bf16.gmra.mrb[72].mxu0 %vm499_vm2, %v788_v32 }
 0x1fe   :  { %v666_v36 = vpop.f32.mrb[74].mxu1  ;;  %1841 = vmatprep.mubr.msk.bf16.mxu0 %vm2013_vm0, %v2012_v1 }
 0x1ff   :  { %v667_v37 = vadd.f32 %v2315_v23, %v666_v36  ;;  %v1764_v38 = vpop.f32.mrb[75].mxu1  ;;  %v760_v39 = vmax.f32 %v664_v34, 0.0 }
 0x201   :  { %v761_v40 = vmax.f32 %v667_v37, 0.0 }
 0x203   :  { %v789_v41 = vpack.c.bf16 %v761_v40, %v760_v39 }
 0x204   :  { %v671_v42 = vpop.f32.mrb[76].mxu1 }
 0x205   :  { %v672_v43 = vadd.f32 %v2315_v23, %v671_v42  ;;  %v1767_v45 = vpop.f32.mrb[77].mxu1  ;;  %1842 = vmatmul.mubr.msk.bf16.gmra.mrb[76].mxu0 %vm499_vm2, %v789_v41 }
 0x206   :  { %v674_v46 = vpop.f32.mrb[78].mxu1  ;;  %1845 = vmatprep.mubr.msk.bf16.mxu0 %vm2013_vm0, %v2012_v1 }
 0x207   :  { %v675_v47 = vadd.f32 %v2315_v23, %v674_v46  ;;  %v1768_v48 = vpop.f32.mrb[79].mxu1  ;;  %v762_v49 = vmax.f32 %v672_v43, 0.0 }
 0x209   :  { %v763_v51 = vmax.f32 %v675_v47, 0.0 }
 0x20b   :  { %v790_v52 = vpack.c.bf16 %v763_v51, %v762_v49 }
 0x20c   :  { %v679_v53 = vpop.f32.mrb[80].mxu1 }
 0x20d   :  { %v680_v54 = vadd.f32 %v2315_v23, %v679_v53  ;;  %v1771_v55 = vpop.f32.mrb[81].mxu1  ;;  %1846 = vmatmul.mubr.msk.bf16.gmra.mrb[80].mxu0 %vm499_vm2, %v790_v52 }
 0x20e   :  { %v682_v56 = vpop.f32.mrb[82].mxu1  ;;  %1849 = vmatprep.mubr.msk.bf16.mxu0 %vm2013_vm0, %v2012_v1 }
 0x20f   :  { %v683_v57 = vadd.f32 %v2315_v23, %v682_v56  ;;  %v1772_v58 = vpop.f32.mrb[83].mxu1  ;;  %v764_v59 = vmax.f32 %v680_v54, 0.0 }
 0x211   :  { %v765_v60 = vmax.f32 %v683_v57, 0.0 }
 0x213   :  { %v791_v61 = vpack.c.bf16 %v765_v60, %v764_v59 }
 0x214   :  { %v687_v62 = vpop.f32.mrb[84].mxu1 }
 0x215   :  { %v688_v0 = vadd.f32 %v2315_v23, %v687_v62  ;;  %v1775_v2 = vpop.f32.mrb[85].mxu1  ;;  %1850 = vmatmul.mubr.msk.bf16.gmra.mrb[84].mxu0 %vm499_vm2, %v791_v61 }
 0x216   :  { %v690_v3 = vpop.f32.mrb[86].mxu1  ;;  %1853 = vmatprep.mubr.msk.bf16.mxu0 %vm2013_vm0, %v2012_v1 }
 0x217   :  { %v691_v4 = vadd.f32 %v2315_v23, %v690_v3  ;;  %v1776_v5 = vpop.f32.mrb[87].mxu1  ;;  %v766_v7 = vmax.f32 %v688_v0, 0.0  ;;  %v2413_v0 = vld [vmem:[%s2471_s6] ss:$0 sm:$0xff]  ;;  %s2014_s6 = smov [#allocation2]  }
 0x218   :  { %s1297_s24 = sshll.u32 %s2014_s6, 4  ;;  %s1298_s24 = int_to_ptr.vmem [resolvable:$true] %s1297_s24 }
 0x219   :  { %v767_v8 = vmax.f32 %v691_v4, 0.0  ;;  %s1988_s25 = scalar_lea.vmem %s1298_s24, 2432  ;;  %p1993_p1 = scmp.lt.s32.totalorder %s1298_s24, %s1298_s24 }
 0x21a   :  { %p1989_p0 = scmp.ne.s32.totalorder %s1298_s24, %s1988_s25  ;;  %p1994_p2 = scmp.lt.s32.totalorder %s1988_s25, %s1988_s25 }
 0x21b   :  { %v792_v9 = vpack.c.bf16 %v767_v8, %v766_v7 }
 0x21c   :  { %v695_v10 = vpop.f32.mrb[88].mxu1  ;;  %p1995_p3 = por %p1994_p2, %p1993_p1 }
 0x21d   :  { %v696_v11 = vadd.f32 %v2315_v23, %v695_v10  ;;  %v1779_v12 = vpop.f32.mrb[89].mxu1  ;;  %1854 = vmatmul.mubr.msk.bf16.gmra.mrb[88].mxu0 %vm499_vm2, %v792_v9 }
 0x21e   :  { %v698_v13 = vpop.f32.mrb[90].mxu1  ;;  %1857 = vmatprep.mubr.msk.bf16.mxu0 %vm2013_vm0, %v2012_v1  ;;  %p1996_p4 = pnand %p1995_p3, %p1989_p0 }
 0x21f   :  { %v699_v14 = vadd.f32 %v2315_v23, %v698_v13  ;;  %v1780_v15 = vpop.f32.mrb[91].mxu1  ;;  %v768_v16 = vmax.f32 %v696_v11, 0.0 }
 0x221   :  { %v769_v50 = vmax.f32 %v699_v14, 0.0 }
 0x223   :  { %v793_v6 = vpack.c.bf16 %v769_v50, %v768_v16 }
 0x224   :  { %v703_v26 = vpop.f32.mrb[92].mxu1 }
 0x225   :  { %v704_v44 = vadd.f32 %v2315_v23, %v703_v26  ;;  %v1783_v63 = vpop.f32.mrb[93].mxu1  ;;  %1858 = vmatmul.mubr.msk.bf16.gmra.mrb[92].mxu0 %vm499_vm2, %v793_v6 }
 0x226   :  { %v706_v17 = vpop.f32.mrb[94].mxu1  ;;  %1861 = vmatprep.mubr.msk.bf16.mxu0 %vm2013_vm0, %v2012_v1 }
 0x227   :  { %v707_v18 = vadd.f32 %v2315_v23, %v706_v17  ;;  %v1784_v19 = vpop.f32.mrb[95].mxu1  ;;  %v770_v20 = vmax.f32 %v704_v44, 0.0 }
 0x229   :  { %v771_v21 = vmax.f32 %v707_v18, 0.0 }
 0x22b   :  { %v794_v22 = vpack.c.bf16 %v771_v21, %v770_v20 }
 0x22c   :  { %v711_v24 = vpop.f32.mrb[96].mxu1 }
 0x22d   :  { %v712_v25 = vadd.f32 %v2315_v23, %v711_v24  ;;  %v1787_v27 = vpop.f32.mrb[97].mxu1  ;;  %1862 = vmatmul.mubr.msk.bf16.gmra.mrb[96].mxu0 %vm499_vm2, %v794_v22 }
 0x22e   :  { %v714_v28 = vpop.f32.mrb[98].mxu1  ;;  %1865 = vmatprep.mubr.msk.bf16.mxu0 %vm2013_vm0, %v2012_v1 }
 0x22f   :  { %v715_v29 = vadd.f32 %v2315_v23, %v714_v28  ;;  %v1788_v30 = vpop.f32.mrb[99].mxu1  ;;  %v772_v31 = vmax.f32 %v712_v25, 0.0 }
 0x231   :  { %v773_v32 = vmax.f32 %v715_v29, 0.0 }
 0x233   :  { %v795_v33 = vpack.c.bf16 %v773_v32, %v772_v31 }
 0x234   :  { %v719_v34 = vpop.f32.mrb[100].mxu1 }
 0x235   :  { %v720_v35 = vadd.f32 %v2315_v23, %v719_v34  ;;  %v1791_v36 = vpop.f32.mrb[101].mxu1  ;;  %1866 = vmatmul.mubr.msk.bf16.gmra.mrb[100].mxu0 %vm499_vm2, %v795_v33 }
 0x236   :  { %v722_v37 = vpop.f32.mrb[102].mxu1  ;;  %1869 = vmatprep.mubr.msk.bf16.mxu0 %vm2013_vm0, %v2012_v1 }
 0x237   :  { %v723_v38 = vadd.f32 %v2315_v23, %v722_v37  ;;  %v1792_v39 = vpop.f32.mrb[103].mxu1  ;;  %v774_v40 = vmax.f32 %v720_v35, 0.0 }
 0x239   :  { %v775_v41 = vmax.f32 %v723_v38, 0.0 }
 0x23b   :  { %v796_v42 = vpack.c.bf16 %v775_v41, %v774_v40 }
 0x23c   :  { %v727_v43 = vpop.f32.mrb[104].mxu1 }
 0x23d   :  { %v728_v45 = vadd.f32 %v2315_v23, %v727_v43  ;;  %v1795_v46 = vpop.f32.mrb[105].mxu1  ;;  %1870 = vmatmul.mubr.msk.bf16.gmra.mrb[104].mxu0 %vm499_vm2, %v796_v42 }
 0x23e   :  { %v730_v47 = vpop.f32.mrb[106].mxu1  ;;  %1873 = vmatprep.mubr.msk.bf16.mxu0 %vm2013_vm0, %v2012_v1 }
 0x23f   :  { %v731_v48 = vadd.f32 %v2315_v23, %v730_v47  ;;  %v1796_v49 = vpop.f32.mrb[107].mxu1  ;;  %v776_v51 = vmax.f32 %v728_v45, 0.0 }
 0x241   :  { %v777_v52 = vmax.f32 %v731_v48, 0.0 }
 0x243   :  { %v797_v53 = vpack.c.bf16 %v777_v52, %v776_v51 }
 0x244   :  { %v735_v54 = vpop.f32.mrb[108].mxu1 }
 0x245   :  { %v736_v55 = vadd.f32 %v2315_v23, %v735_v54  ;;  %v1799_v56 = vpop.f32.mrb[109].mxu1  ;;  %1874 = vmatmul.mubr.msk.bf16.gmra.mrb[108].mxu0 %vm499_vm2, %v797_v53 }
 0x246   :  { %v738_v57 = vpop.f32.mrb[110].mxu1  ;;  %1877 = vmatprep.mubr.msk.bf16.mxu0 %vm2013_vm0, %v2012_v1 }
 0x247   :  { %v739_v58 = vadd.f32 %v2315_v23, %v738_v57  ;;  %v1800_v59 = vpop.f32.mrb[111].mxu1  ;;  %v778_v60 = vmax.f32 %v736_v55, 0.0 }
 0x249   :  { %v779_v61 = vmax.f32 %v739_v58, 0.0 }
 0x24b   :  { %v798_v62 = vpack.c.bf16 %v779_v61, %v778_v60 }
 0x24d   :  { %1878 = vmatmul.mubr.msk.bf16.gmra.mrb[112].mxu0 %vm499_vm2, %v798_v62 }
 0x290   :  { %v913_v2 = vpop.f32.mrb[40].mxu0 }
 0x291   :  { %v914_v3 = vadd.f32 %v2413_v0, %v913_v2  ;;  %v1807_v4 = vpop.f32.mrb[41].mxu0 }
 0x292   :  { %v916_v5 = vpop.f32.mrb[42].mxu0 }
 0x293   :  { %v917_v1 = vadd.f32 %v2413_v0, %v916_v5  ;;  %v1808_v7 = vpop.f32.mrb[43].mxu0  ;;  %1912 = vtanh.f32 %v914_v3 }
 0x295   :  { %1914 = vtanh.f32 %v917_v1 }
 0x298   :  { %v921_v23 = vpop.f32.mrb[44].mxu0 }
 0x299   :  { %v922_v8 = vadd.f32 %v2413_v0, %v921_v23  ;;  %v1811_v9 = vpop.f32.mrb[45].mxu0 }
 0x29a   :  { %v924_v10 = vpop.f32.mrb[46].mxu0 }
 0x29b   :  { %v925_v11 = vadd.f32 %v2413_v0, %v924_v10  ;;  %v1812_v12 = vpop.f32.mrb[47].mxu0  ;;  %1916 = vtanh.f32 %v922_v8 }
 0x29d   :  { %1918 = vtanh.f32 %v925_v11  ;;  %v1913_v13 = vpop.eup %1912 }
 0x29f   :  { %v1915_v14 = vpop.eup %1914 }
 0x2a0   :  { %v1471_v15 = vpack.c.bf16 %v1915_v14, %v1913_v13  ;;  %v929_v16 = vpop.f32.mrb[48].mxu0 }
 0x2a1   :  { %v930_v50 = vadd.f32 %v2413_v0, %v929_v16  ;;  %v1815_v6 = vpop.f32.mrb[49].mxu0 }
 0x2a2   :  { %1472 = vst [vmem:[#allocation2] sm:$0xff] %v1471_v15   ;;  %v932_v26 = vpop.f32.mrb[50].mxu0 }
 0x2a3   :  { %v933_v44 = vadd.f32 %v2413_v0, %v932_v26  ;;  %v1816_v63 = vpop.f32.mrb[51].mxu0  ;;  %1920 = vtanh.f32 %v930_v50 }
 0x2a5   :  { %1922 = vtanh.f32 %v933_v44  ;;  %v1917_v17 = vpop.eup %1916 }
 0x2a7   :  { %v1919_v18 = vpop.eup %1918 }
 0x2a8   :  { %v1476_v19 = vpack.c.bf16 %v1919_v18, %v1917_v17  ;;  %v937_v20 = vpop.f32.mrb[52].mxu0 }
 0x2a9   :  { %v938_v21 = vadd.f32 %v2413_v0, %v937_v20  ;;  %v1819_v22 = vpop.f32.mrb[53].mxu0 }
 0x2aa   :  { %1563 = vst [vmem:[#allocation2 + $0x8] sm:$0xff] %v1476_v19   ;;  %v940_v24 = vpop.f32.mrb[54].mxu0 }
 0x2ab   :  { %v941_v25 = vadd.f32 %v2413_v0, %v940_v24  ;;  %v1820_v27 = vpop.f32.mrb[55].mxu0  ;;  %1924 = vtanh.f32 %v938_v21 }
 0x2ad   :  { %1926 = vtanh.f32 %v941_v25  ;;  %v1921_v28 = vpop.eup %1920 }
 0x2af   :  { %v1923_v29 = vpop.eup %1922 }
 0x2b0   :  { %v1481_v30 = vpack.c.bf16 %v1923_v29, %v1921_v28  ;;  %v945_v31 = vpop.f32.mrb[56].mxu0 }
 0x2b1   :  { %v946_v32 = vadd.f32 %v2413_v0, %v945_v31  ;;  %v1823_v33 = vpop.f32.mrb[57].mxu0 }
 0x2b2   :  { %1564 = vst [vmem:[#allocation2 + $0x10] sm:$0xff] %v1481_v30   ;;  %v948_v34 = vpop.f32.mrb[58].mxu0 }
 0x2b3   :  { %v949_v35 = vadd.f32 %v2413_v0, %v948_v34  ;;  %v1824_v36 = vpop.f32.mrb[59].mxu0  ;;  %1928 = vtanh.f32 %v946_v32 }
 0x2b5   :  { %1930 = vtanh.f32 %v949_v35  ;;  %v1925_v37 = vpop.eup %1924 }
 0x2b7   :  { %v1927_v38 = vpop.eup %1926 }
 0x2b8   :  { %v1486_v39 = vpack.c.bf16 %v1927_v38, %v1925_v37  ;;  %v953_v40 = vpop.f32.mrb[60].mxu0 }
 0x2b9   :  { %v954_v41 = vadd.f32 %v2413_v0, %v953_v40  ;;  %v1827_v42 = vpop.f32.mrb[61].mxu0 }
 0x2ba   :  { %1565 = vst [vmem:[#allocation2 + $0x18] sm:$0xff] %v1486_v39   ;;  %v956_v43 = vpop.f32.mrb[62].mxu0 }
 0x2bb   :  { %v957_v45 = vadd.f32 %v2413_v0, %v956_v43  ;;  %v1828_v46 = vpop.f32.mrb[63].mxu0  ;;  %1932 = vtanh.f32 %v954_v41 }
 0x2bd   :  { %1934 = vtanh.f32 %v957_v45  ;;  %v1929_v47 = vpop.eup %1928 }
 0x2bf   :  { %v1931_v48 = vpop.eup %1930 }
 0x2c0   :  { %v1491_v49 = vpack.c.bf16 %v1931_v48, %v1929_v47  ;;  %v961_v51 = vpop.f32.mrb[64].mxu0 }
 0x2c1   :  { %v962_v52 = vadd.f32 %v2413_v0, %v961_v51  ;;  %v1831_v53 = vpop.f32.mrb[65].mxu0 }
 0x2c2   :  { %1566 = vst [vmem:[#allocation2 + $0x20] sm:$0xff] %v1491_v49   ;;  %v964_v54 = vpop.f32.mrb[66].mxu0 }
 0x2c3   :  { %v965_v55 = vadd.f32 %v2413_v0, %v964_v54  ;;  %v1832_v56 = vpop.f32.mrb[67].mxu0  ;;  %1936 = vtanh.f32 %v962_v52 }
 0x2c5   :  { %1938 = vtanh.f32 %v965_v55  ;;  %v1933_v57 = vpop.eup %1932 }
 0x2c7   :  { %v1935_v58 = vpop.eup %1934 }
 0x2c8   :  { %v1496_v59 = vpack.c.bf16 %v1935_v58, %v1933_v57  ;;  %v969_v60 = vpop.f32.mrb[68].mxu0 }
 0x2c9   :  { %v970_v61 = vadd.f32 %v2413_v0, %v969_v60  ;;  %v1835_v62 = vpop.f32.mrb[69].mxu0 }
 0x2ca   :  { %1567 = vst [vmem:[#allocation2 + $0x28] sm:$0xff] %v1496_v59   ;;  %v972_v2 = vpop.f32.mrb[70].mxu0 }
 0x2cb   :  { %v973_v3 = vadd.f32 %v2413_v0, %v972_v2  ;;  %v1836_v4 = vpop.f32.mrb[71].mxu0  ;;  %1940 = vtanh.f32 %v970_v61 }
 0x2cd   :  { %1942 = vtanh.f32 %v973_v3  ;;  %v1937_v5 = vpop.eup %1936 }
 0x2cf   :  { %v1939_v1 = vpop.eup %1938 }
 0x2d0   :  { %v1501_v7 = vpack.c.bf16 %v1939_v1, %v1937_v5  ;;  %v977_v23 = vpop.f32.mrb[72].mxu0 }
 0x2d1   :  { %v978_v8 = vadd.f32 %v2413_v0, %v977_v23  ;;  %v1839_v9 = vpop.f32.mrb[73].mxu0 }
 0x2d2   :  { %1568 = vst [vmem:[#allocation2 + $0x30] sm:$0xff] %v1501_v7   ;;  %v980_v10 = vpop.f32.mrb[74].mxu0 }
 0x2d3   :  { %v981_v11 = vadd.f32 %v2413_v0, %v980_v10  ;;  %v1840_v12 = vpop.f32.mrb[75].mxu0  ;;  %1944 = vtanh.f32 %v978_v8 }
 0x2d5   :  { %1946 = vtanh.f32 %v981_v11  ;;  %v1941_v13 = vpop.eup %1940 }
 0x2d7   :  { %v1943_v14 = vpop.eup %1942 }
 0x2d8   :  { %v1506_v15 = vpack.c.bf16 %v1943_v14, %v1941_v13  ;;  %v985_v16 = vpop.f32.mrb[76].mxu0 }
 0x2d9   :  { %v986_v50 = vadd.f32 %v2413_v0, %v985_v16  ;;  %v1843_v6 = vpop.f32.mrb[77].mxu0 }
 0x2da   :  { %1569 = vst [vmem:[#allocation2 + $0x38] sm:$0xff] %v1506_v15   ;;  %v988_v26 = vpop.f32.mrb[78].mxu0 }
 0x2db   :  { %v989_v44 = vadd.f32 %v2413_v0, %v988_v26  ;;  %v1844_v63 = vpop.f32.mrb[79].mxu0  ;;  %1948 = vtanh.f32 %v986_v50 }
 0x2dd   :  { %1950 = vtanh.f32 %v989_v44  ;;  %v1945_v17 = vpop.eup %1944 }
 0x2df   :  { %v1947_v18 = vpop.eup %1946 }
 0x2e0   :  { %v1511_v19 = vpack.c.bf16 %v1947_v18, %v1945_v17  ;;  %v993_v20 = vpop.f32.mrb[80].mxu0 }
 0x2e1   :  { %v994_v21 = vadd.f32 %v2413_v0, %v993_v20  ;;  %v1847_v22 = vpop.f32.mrb[81].mxu0 }
 0x2e2   :  { %1570 = vst [vmem:[#allocation2 + $0x40] sm:$0xff] %v1511_v19   ;;  %v996_v24 = vpop.f32.mrb[82].mxu0 }
 0x2e3   :  { %v997_v25 = vadd.f32 %v2413_v0, %v996_v24  ;;  %v1848_v27 = vpop.f32.mrb[83].mxu0  ;;  %1952 = vtanh.f32 %v994_v21 }
 0x2e5   :  { %1954 = vtanh.f32 %v997_v25  ;;  %v1949_v28 = vpop.eup %1948 }
 0x2e7   :  { %v1951_v29 = vpop.eup %1950 }
 0x2e8   :  { %v1516_v30 = vpack.c.bf16 %v1951_v29, %v1949_v28  ;;  %v1001_v31 = vpop.f32.mrb[84].mxu0 }
 0x2e9   :  { %v1002_v32 = vadd.f32 %v2413_v0, %v1001_v31  ;;  %v1851_v33 = vpop.f32.mrb[85].mxu0 }
 0x2ea   :  { %1571 = vst [vmem:[#allocation2 + $0x48] sm:$0xff] %v1516_v30   ;;  %v1004_v34 = vpop.f32.mrb[86].mxu0 }
 0x2eb   :  { %v1005_v35 = vadd.f32 %v2413_v0, %v1004_v34  ;;  %v1852_v36 = vpop.f32.mrb[87].mxu0  ;;  %1956 = vtanh.f32 %v1002_v32 }
 0x2ed   :  { %1958 = vtanh.f32 %v1005_v35  ;;  %v1953_v37 = vpop.eup %1952 }
 0x2ef   :  { %v1955_v38 = vpop.eup %1954 }
 0x2f0   :  { %v1521_v39 = vpack.c.bf16 %v1955_v38, %v1953_v37  ;;  %v1009_v40 = vpop.f32.mrb[88].mxu0 }
 0x2f1   :  { %v1010_v41 = vadd.f32 %v2413_v0, %v1009_v40  ;;  %v1855_v42 = vpop.f32.mrb[89].mxu0 }
 0x2f2   :  { %1572 = vst [vmem:[#allocation2 + $0x50] sm:$0xff] %v1521_v39   ;;  %v1012_v43 = vpop.f32.mrb[90].mxu0 }
 0x2f3   :  { %v1013_v45 = vadd.f32 %v2413_v0, %v1012_v43  ;;  %v1856_v46 = vpop.f32.mrb[91].mxu0  ;;  %1960 = vtanh.f32 %v1010_v41 }
 0x2f5   :  { %1962 = vtanh.f32 %v1013_v45  ;;  %v1957_v47 = vpop.eup %1956 }
 0x2f7   :  { %v1959_v48 = vpop.eup %1958 }
 0x2f8   :  { %v1526_v49 = vpack.c.bf16 %v1959_v48, %v1957_v47  ;;  %v1017_v51 = vpop.f32.mrb[92].mxu0 }
 0x2f9   :  { %v1018_v52 = vadd.f32 %v2413_v0, %v1017_v51  ;;  %v1859_v53 = vpop.f32.mrb[93].mxu0 }
 0x2fa   :  { %1573 = vst [vmem:[#allocation2 + $0x58] sm:$0xff] %v1526_v49   ;;  %v1020_v54 = vpop.f32.mrb[94].mxu0 }
 0x2fb   :  { %v1021_v55 = vadd.f32 %v2413_v0, %v1020_v54  ;;  %v1860_v56 = vpop.f32.mrb[95].mxu0  ;;  %1964 = vtanh.f32 %v1018_v52 }
 0x2fd   :  { %1966 = vtanh.f32 %v1021_v55  ;;  %v1961_v57 = vpop.eup %1960 }
 0x2ff   :  { %v1963_v58 = vpop.eup %1962 }
 0x300   :  { %v1531_v59 = vpack.c.bf16 %v1963_v58, %v1961_v57  ;;  %v1025_v60 = vpop.f32.mrb[96].mxu0 }
 0x301   :  { %v1026_v61 = vadd.f32 %v2413_v0, %v1025_v60  ;;  %v1863_v62 = vpop.f32.mrb[97].mxu0 }
 0x302   :  { %1574 = vst [vmem:[#allocation2 + $0x60] sm:$0xff] %v1531_v59   ;;  %v1028_v2 = vpop.f32.mrb[98].mxu0 }
 0x303   :  { %v1029_v3 = vadd.f32 %v2413_v0, %v1028_v2  ;;  %v1864_v4 = vpop.f32.mrb[99].mxu0  ;;  %1968 = vtanh.f32 %v1026_v61 }
 0x305   :  { %1970 = vtanh.f32 %v1029_v3  ;;  %v1965_v5 = vpop.eup %1964 }
 0x307   :  { %v1967_v1 = vpop.eup %1966 }
 0x308   :  { %v1536_v7 = vpack.c.bf16 %v1967_v1, %v1965_v5  ;;  %v1033_v23 = vpop.f32.mrb[100].mxu0 }
 0x309   :  { %v1034_v8 = vadd.f32 %v2413_v0, %v1033_v23  ;;  %v1867_v9 = vpop.f32.mrb[101].mxu0 }
 0x30a   :  { %1575 = vst [vmem:[#allocation2 + $0x68] sm:$0xff] %v1536_v7   ;;  %v1036_v10 = vpop.f32.mrb[102].mxu0 }
 0x30b   :  { %v1037_v11 = vadd.f32 %v2413_v0, %v1036_v10  ;;  %v1868_v12 = vpop.f32.mrb[103].mxu0  ;;  %1972 = vtanh.f32 %v1034_v8 }
 0x30d   :  { %1974 = vtanh.f32 %v1037_v11  ;;  %v1969_v13 = vpop.eup %1968 }
 0x30f   :  { %v1971_v14 = vpop.eup %1970 }
 0x310   :  { %v1541_v15 = vpack.c.bf16 %v1971_v14, %v1969_v13  ;;  %v1041_v16 = vpop.f32.mrb[104].mxu0 }
 0x311   :  { %v1042_v50 = vadd.f32 %v2413_v0, %v1041_v16  ;;  %v1871_v6 = vpop.f32.mrb[105].mxu0 }
 0x312   :  { %1576 = vst [vmem:[#allocation2 + $0x70] sm:$0xff] %v1541_v15   ;;  %v1044_v26 = vpop.f32.mrb[106].mxu0 }
 0x313   :  { %v1045_v44 = vadd.f32 %v2413_v0, %v1044_v26  ;;  %v1872_v63 = vpop.f32.mrb[107].mxu0  ;;  %1976 = vtanh.f32 %v1042_v50 }
 0x315   :  { %1978 = vtanh.f32 %v1045_v44  ;;  %v1973_v17 = vpop.eup %1972 }
 0x317   :  { %v1975_v18 = vpop.eup %1974 }
 0x318   :  { %v1546_v19 = vpack.c.bf16 %v1975_v18, %v1973_v17  ;;  %v1049_v20 = vpop.f32.mrb[108].mxu0 }
 0x319   :  { %v1050_v21 = vadd.f32 %v2413_v0, %v1049_v20  ;;  %v1875_v22 = vpop.f32.mrb[109].mxu0 }
 0x31a   :  { %1577 = vst [vmem:[#allocation2 + $0x78] sm:$0xff] %v1546_v19   ;;  %v1052_v24 = vpop.f32.mrb[110].mxu0 }
 0x31b   :  { %v1053_v25 = vadd.f32 %v2413_v0, %v1052_v24  ;;  %v1876_v27 = vpop.f32.mrb[111].mxu0  ;;  %1980 = vtanh.f32 %v1050_v21 }
 0x31d   :  { %1982 = vtanh.f32 %v1053_v25  ;;  %v1977_v28 = vpop.eup %1976 }
 0x31f   :  { %v1979_v29 = vpop.eup %1978 }
 0x320   :  { %v1551_v30 = vpack.c.bf16 %v1979_v29, %v1977_v28  ;;  %v1057_v31 = vpop.f32.mrb[112].mxu0 }
 0x321   :  { %v1058_v32 = vadd.f32 %v2413_v0, %v1057_v31  ;;  %v1879_v33 = vpop.f32.mrb[113].mxu0 }
 0x322   :  { %1578 = vst [vmem:[#allocation2 + $0x80] sm:$0xff] %v1551_v30   ;;  %v1060_v34 = vpop.f32.mrb[114].mxu0 }
 0x323   :  { %v1061_v35 = vadd.f32 %v2413_v0, %v1060_v34  ;;  %v1880_v36 = vpop.f32.mrb[115].mxu0  ;;  %1984 = vtanh.f32 %v1058_v32 }
 0x325   :  { %1986 = vtanh.f32 %v1061_v35  ;;  %v1981_v37 = vpop.eup %1980 }
 0x327   :  { %v1983_v38 = vpop.eup %1982 }
 0x328   :  { %v1556_v39 = vpack.c.bf16 %v1983_v38, %v1981_v37 }
 0x32a   :  { %1579 = vst [vmem:[#allocation2 + $0x88] sm:$0xff] %v1556_v39  }
 0x32d   :  { %v1985_v40 = vpop.eup %1984 }
 0x32f   :  { %v1987_v41 = vpop.eup %1986 }
 0x330   :  { %v1561_v42 = vpack.c.bf16 %v1987_v41, %v1985_v40 }
 0x332   :  { %1580 = vst [vmem:[#allocation2 + $0x90] sm:$0xff] %v1561_v42  }
 0x333   :  { %1999 = shalt.err (!%p1996_p4)
}
 0x334   :  { %s2000_s1 = scalar_lea.hbm %s2472_s7, 2432 }
 0x335   :  { %p2001_p5 = scmp.ne.s32.totalorder %s2472_s7, %s2000_s1  ;;  %p2004_p6 = scmp.lt.u32.totalorder %s2000_s1, %s2472_s7 }
 0x337   :  { %p2006_p7 = pnand %p2004_p6, %p2001_p5 }
 0x339   :  { %2009 = shalt.err (!%p2006_p7)
}
 0x33a   :  { %s2015_s9 = smov 64   ;;  %s2016_s10 = smov 4  }
 0x33b   :  { %1303 = dma.vmem_to_hbm [thread:$0]  %s1298_s24, 2432, %s2472_s7, [#allocation3], %s2015_s9, %s2015_s9, %s2016_s10  }
 0x33c   :  { %2010 = dma.done.wait [#allocation3], 2432  }
 0x33d   :  { %2011 = vsyncadd [#allocation3], 4294964864 }
 0x33e   :  { %1307 = vsyncpa [#allocation3], 1 }

</bundles_post_ra>
